<compile_context>
chip_gen: v7x
topology: tpu7x:2x2x1
jax: 0.10.0
libtpu: 0.0.40
codegen_flags: <defaults>
</compile_context>

<pallas_src>
import jax
import jax.numpy as jnp
from jax.experimental import pallas as pl
from jax.experimental.pallas import tpu as pltpu


def mmtm_kernel(vis_ref, sk_ref, wsq_ref, bsq_ref, wg_ref, bg_ref, out_ref):
    # Single prologue concat, reused for the squeeze matmul AND the row-mean.
    x = jnp.concatenate([vis_ref[...], sk_ref[...]], axis=-1)            # (B, D)

    # excitation = relu(fc_squeeze(cat(visual, skeleton)))
    exc = jnp.dot(x, wsq_ref[...], preferred_element_type=jnp.float32)
    exc = jnp.maximum(exc + bsq_ref[...], 0.0)                           # (B, dim_out)

    # Fused gate matmul: sigmoid(exc @ [w_v | w_s] + [b_v | b_s]) — one MXU push,
    # one EUP sigmoid pass, result already in the final output lane layout.
    gate = jax.nn.sigmoid(
        jnp.dot(exc, wg_ref[...], preferred_element_type=jnp.float32) + bg_ref[...])  # (B, D)

    # (modality * repeated_gate).mean(1) == mean over batch rows of modality, * gate.
    x_mean = jnp.mean(x, axis=0, keepdims=True)                          # (1, D)
    out_ref[...] = x_mean * gate                                         # no epilogue concat


def mmtm_forward(visual, skeleton, params):
    B, Dv = visual.shape
    Bs, Ds = skeleton.shape
    assert Bs == B, "visual and skeleton must share the batch dimension"
    # The PyTorch forward's broadcast is only well-defined when B == 1 (union_model's
    # actual call pattern) or B == Dv == Ds. Enforce it so callers don't silently get
    # results matching neither PyTorch nor sensible semantics.
    assert B == 1 or (B == Dv and B == Ds), (
        "MMTM (as written in PyTorch) requires batch == 1 or batch == dim_visual == dim_skeleton")

    # Fuse the two gate Linears into one matmul operand (layout transform only).
    w_gates = jnp.concatenate([params["w_v"], params["w_s"]], axis=1)    # (dim_out, Dv+Ds)
    b_gates = jnp.concatenate([params["b_v"], params["b_s"]], axis=-1)   # (1, Dv+Ds)

    vmem = pl.BlockSpec(memory_space=pltpu.MemorySpace.VMEM)
    return pl.pallas_call(
        mmtm_kernel,
        out_shape=jax.ShapeDtypeStruct((B, Dv + Ds), jnp.float32),
        in_specs=[vmem] * 6,
        out_specs=vmem,
        compiler_params=pltpu.CompilerParams(vmem_limit_bytes=32 * 1024 * 1024),
    )(visual, skeleton, params["w_sq"], params["b_sq"], w_gates, b_gates)


def init_params(key, dim_visual, dim_skeleton, ratio):
    """Deterministic init mirroring nn.Linear's U(-1/sqrt(fan_in), 1/sqrt(fan_in))."""
    dim = dim_visual + dim_skeleton
    dim_out = int(2 * dim / ratio)
    ks = jax.random.split(key, 6)

    def lin(kw, kb, fan_in, fan_out):
        bound = 1.0 / jnp.sqrt(fan_in)
        w = jax.random.uniform(kw, (fan_in, fan_out), jnp.float32, -bound, bound)
        b = jax.random.uniform(kb, (1, fan_out), jnp.float32, -bound, bound)
        return w, b

    w_sq, b_sq = lin(ks[0], ks[1], dim, dim_out)
    w_v, b_v = lin(ks[2], ks[3], dim_out, dim_visual)
    w_s, b_s = lin(ks[4], ks[5], dim_out, dim_skeleton)
    return dict(w_sq=w_sq, b_sq=b_sq, w_v=w_v, b_v=b_v, w_s=w_s, b_s=b_s)


def ref_forward(visual, skeleton, p):
    """Pure-JAX reference reproducing the exact PyTorch broadcasting (f32 matmuls)."""
    hp = jax.lax.Precision.HIGHEST
    x = jnp.concatenate([visual, skeleton], axis=-1)
    exc = jax.nn.relu(jnp.dot(x, p["w_sq"], precision=hp) + p["b_sq"][0])
    vg = jax.nn.sigmoid(jnp.dot(exc, p["w_v"], precision=hp) + p["b_v"][0])
    sg = jax.nn.sigmoid(jnp.dot(exc, p["w_s"], precision=hp) + p["b_s"][0])
    vg3 = jnp.repeat(vg[:, None, :], visual.shape[1], axis=1)            # (B, Dv, Dv)
    vres = (visual[None, :, :] * vg3).mean(axis=1)                       # torch-style broadcast
    sg3 = jnp.repeat(sg[:, None, :], skeleton.shape[1], axis=1)
    sres = (skeleton[None, :, :] * sg3).mean(axis=1)
    return jnp.concatenate([vres, sres], axis=-1)


def _check(B, dim_visual, dim_skeleton, ratio, key):
    k_vis, k_sk, k_par = jax.random.split(key, 3)
    visual = jax.random.normal(k_vis, (B, dim_visual), jnp.float32)
    skeleton = jax.random.normal(k_sk, (B, dim_skeleton), jnp.float32)
    params = init_params(k_par, dim_visual, dim_skeleton, ratio)

    out = jax.block_until_ready(mmtm_forward(visual, skeleton, params))
    ref = ref_forward(visual, skeleton, params)

    assert out.shape == (B, dim_visual + dim_skeleton)
    assert jnp.allclose(out, ref, atol=1e-4, rtol=1e-4), (
        f"mismatch vs reference at B={B}, Dv={dim_visual}, Ds={dim_skeleton}")


if __name__ == "__main__":
    key = jax.random.PRNGKey(0)
    k1, k2 = jax.random.split(key)

    # Small case exercising the B == Dv == Ds row-mean broadcast quirk.
    _check(B=16, dim_visual=16, dim_skeleton=16, ratio=4, key=k1)

    # Lane-dense, MXU-aligned case at union_model-like ratio (MMTM(d, d, 1.0)):
    # output is (128, 256) -> unmasked 128-lane stores, M=128 MXU tiles.
    _check(B=128, dim_visual=128, dim_skeleton=128, ratio=1.0, key=k2)

    print("KERNEL_OK")
</pallas_src>

<mosaic_0001>
module attributes {stable_mosaic.version = 11 : i64} {
  func.func @mmtm_kernel(%arg0: memref<16x16xf32, #tpu.memory_space<vmem>>, %arg1: memref<16x16xf32, #tpu.memory_space<vmem>>, %arg2: memref<32x16xf32, #tpu.memory_space<vmem>>, %arg3: memref<1x16xf32, #tpu.memory_space<vmem>>, %arg4: memref<16x32xf32, #tpu.memory_space<vmem>>, %arg5: memref<1x32xf32, #tpu.memory_space<vmem>>, %arg6: memref<16x32xf32, #tpu.memory_space<vmem>>) attributes {dimension_semantics = [], scalar_prefetch = 0 : i64, scratch_operands = 0 : i64, tpu.core_type = #tpu.core_type<tc>} {
    %c0 = arith.constant 0 : index
    %c0_0 = arith.constant 0 : index
    %0 = vector.load %arg0[%c0, %c0_0] : memref<16x16xf32, #tpu.memory_space<vmem>>, vector<16x16xf32>
    %c0_1 = arith.constant 0 : index
    %c0_2 = arith.constant 0 : index
    %1 = vector.load %arg1[%c0_1, %c0_2] : memref<16x16xf32, #tpu.memory_space<vmem>>, vector<16x16xf32>
    %2 = tpu.concatenate %0, %1 in 1 : vector<16x16xf32>, vector<16x16xf32> -> vector<16x32xf32>
    %c0_3 = arith.constant 0 : index
    %c0_4 = arith.constant 0 : index
    %3 = vector.load %arg2[%c0_3, %c0_4] : memref<32x16xf32, #tpu.memory_space<vmem>>, vector<32x16xf32>
    %cst = arith.constant dense<0.000000e+00> : vector<16x16xf32>
    %4 = tpu.matmul %2, %3, %cst {dimension_numbers = #tpu.dot_dimension_numbers<[1], [0], [0], [1], [0, 0, 1, 1], [], []>} : vector<16x32xf32>, vector<32x16xf32>, vector<16x16xf32> -> vector<16x16xf32>
    %c0_5 = arith.constant 0 : index
    %c0_6 = arith.constant 0 : index
    %5 = vector.load %arg3[%c0_5, %c0_6] : memref<1x16xf32, #tpu.memory_space<vmem>>, vector<1x16xf32>
    %6 = vector.broadcast %5 : vector<1x16xf32> to vector<16x16xf32>
    %7 = arith.addf %4, %6 : vector<16x16xf32>
    %cst_7 = arith.constant 0.000000e+00 : f32
    %8 = vector.broadcast %cst_7 : f32 to vector<16x16xf32>
    %9 = arith.maximumf %7, %8 : vector<16x16xf32>
    %c0_8 = arith.constant 0 : index
    %c0_9 = arith.constant 0 : index
    %10 = vector.load %arg4[%c0_8, %c0_9] : memref<16x32xf32, #tpu.memory_space<vmem>>, vector<16x32xf32>
    %cst_10 = arith.constant dense<0.000000e+00> : vector<16x32xf32>
    %11 = tpu.matmul %9, %10, %cst_10 {dimension_numbers = #tpu.dot_dimension_numbers<[1], [0], [0], [1], [0, 0, 1, 1], [], []>} : vector<16x16xf32>, vector<16x32xf32>, vector<16x32xf32> -> vector<16x32xf32>
    %c0_11 = arith.constant 0 : index
    %c0_12 = arith.constant 0 : index
    %12 = vector.load %arg5[%c0_11, %c0_12] : memref<1x32xf32, #tpu.memory_space<vmem>>, vector<1x32xf32>
    %13 = vector.broadcast %12 : vector<1x32xf32> to vector<16x32xf32>
    %14 = arith.addf %11, %13 : vector<16x32xf32>
    %15 = arith.negf %14 : vector<16x32xf32>
    %16 = math.exp %15 : vector<16x32xf32>
    %cst_13 = arith.constant 1.000000e+00 : f32
    %17 = vector.broadcast %cst_13 : f32 to vector<16x32xf32>
    %18 = arith.addf %17, %16 : vector<16x32xf32>
    %19 = arith.divf %17, %18 : vector<16x32xf32>
    %cst_14 = arith.constant dense<0.000000e+00> : vector<32xf32>
    %20 = vector.multi_reduction <add>, %2, %cst_14 [0] : vector<16x32xf32> to vector<32xf32>
    %21 = vector.shape_cast %20 : vector<32xf32> to vector<1x32xf32>
    %cst_15 = arith.constant 1.600000e+01 : f32
    %22 = vector.broadcast %cst_15 : f32 to vector<1x32xf32>
    %23 = arith.divf %21, %22 : vector<1x32xf32>
    %24 = vector.broadcast %23 : vector<1x32xf32> to vector<16x32xf32>
    %25 = arith.mulf %24, %19 : vector<16x32xf32>
    %c0_16 = arith.constant 0 : index
    %c0_17 = arith.constant 0 : index
    %26 = vector.load %arg6[%c0_16, %c0_17] : memref<16x32xf32, #tpu.memory_space<vmem>>, vector<16x32xf32>
    tpu.vector_store %arg6[%c0_16, %c0_17], %25 {strides = array<i32>} : memref<16x32xf32, #tpu.memory_space<vmem>>, vector<16x32xf32>,
    return
  }
}

</mosaic_0001>

<bundles_post_ra>
// kernel: tpu_custom_call.1
= control target key start
LH: loop header
LB: loop body
LE: loop exit
PB: predicated region body
PF: predicated region fallthrough
CT: control target
= control target key end

     0   :  { %s351_s25 = smov 16   ;;  %s448_s0 = inlined_call_operand.vmem [shape: f32[16,16], index: 0, kind: input, shape index: {}]   ;;  %s449_s1 = inlined_call_operand.vmem [shape: f32[16,16], index: 1, kind: input, shape index: {}]   ;;  %s450_s2 = inlined_call_operand.vmem [shape: f32[32,16], index: 2, kind: input, shape index: {}]   ;;  %s451_s3 = inlined_call_operand.vmem [shape: f32[1,16], index: 3, kind: input, shape index: {}]   ;;  %s452_s4 = inlined_call_operand.vmem [shape: f32[16,32], index: 4, kind: input, shape index: {}]   ;;  %s453_s5 = inlined_call_operand.vmem [shape: f32[1,32], index: 5, kind: input, shape index: {}]   ;;  %s454_s6 = inlined_call_operand.hbm [shape: f32[16,32], index: 6, kind: output, shape index: {}]  }
   0x1   :  { %v26_v0 = vld [vmem:[%s449_s1] sm:$0xff]  ;;  %v40_v2 = vld [vmem:[%s450_s2 + $0x8] sm:$0xff]  ;;  %v41_v3 = vld [vmem:[%s450_s2 + $0x10] sm:$0xff] }
   0x2   :  { %v39_v1 = vld [vmem:[%s450_s2] sm:$0xff]  ;;  %30 = vrot.lane.b32.xlu0 %v26_v0, %s351_s25  ;;  %v42_v4 = vld [vmem:[%s450_s2 + $0x18] sm:$0xff]  ;;  %v27_v5 = vld [vmem:[%s449_s1 + $0x8] sm:$0xff] }
   0x3   :  { %v303_v6 = vpack.c.bf16 %v40_v2, %v39_v1  ;;  %v307_v7 = vpack.c.bf16 %v42_v4, %v41_v3 }
   0x4   :  { %11 = vsyncpa [#allocation3], 0  ;;  %v24_v8 = vld [vmem:[%s448_s0] sm:$0xff]  ;;  %vm36_vm0 = vcmask 130048   ;;  %vm50_vm1 = vcmask 261120   ;;  %v25_v11 = vld [vmem:[%s448_s0 + $0x8] sm:$0xff] }
   0x5   :  { %304 = vmatprep.subr.bf16.mxu0 %v303_v6  ;;  %v134_v17 = vld [vmem:[%s452_s4] sm:$0xff]  ;;  %v135_v18 = vld [vmem:[%s452_s4 + $0x8] sm:$0xff] }
   0x6   :  { %32 = vrot.lane.b32.xlu0 %v27_v5, %s351_s25  ;;  %306 = vmatpush3.bf16.msra.mxu0 %v303_v6  ;;  %v311_v19 = vpack.c.bf16 %v135_v18, %v134_v17  ;;  %v267_v20 = vld [vmem:[%s451_s3] ss:$0 sm:$0xff]  ;;  %s352_s3 = smov [#allocation2]  }
   0x7   :  { %308 = vmatprep.subr.bf16.mxu0 %v307_v7  ;;  %v270_v27 = vld [vmem:[%s453_s5] ss:$0 sm:$0xff]  ;;  %s256_s4 = sshll.u32 %s352_s3, 4  ;;  %s257_s4 = int_to_ptr.vmem [resolvable:$true] %s256_s4 }
   0x8   :  { %312 = vmatprep.subr.bf16.mxu1 %v311_v19  ;;  %s327_s5 = scalar_lea.vmem %s257_s4, 256  ;;  %p332_p1 = scmp.lt.s32.totalorder %s257_s4, %s257_s4 }
   0x9   :  { %314 = vmatpush3.bf16.msra.mxu1 %v311_v19  ;;  %p328_p0 = scmp.ne.s32.totalorder %s257_s4, %s327_s5  ;;  %p333_p2 = scmp.lt.s32.totalorder %s327_s5, %s327_s5 }
   0xa   :  { %310 = vmatpush3.bf16.msra.mxu0 %v307_v7 }
   0xb   :  { %p334_p3 = por %p333_p2, %p332_p1 }
   0xd   :  { %p335_p4 = pnand %p334_p3, %p328_p0 }
  0x74   :  { %v31_v9 = vpop.permute.xlu0 %30 }
  0x75   :  { %v37_v10 = vsel %vm36_vm0, %v24_v8, %v31_v9 }
  0x76   :  { %293 = vmatprep.mubr.msk.f32.mxu0 %vm50_vm1, %v37_v10  ;;  %v236_v14 = vsel %vm50_vm1, %v37_v10, 0.0 }
  0x78   :  { %v33_v12 = vpop.permute.xlu0 %32 }
  0x79   :  { %v38_v13 = vsel %vm36_vm0, %v25_v11, %v33_v12 }
  0x7a   :  { %v237_v15 = vsel %vm50_vm1, %v38_v13, 0.0  ;;  %294 = vmatmul.mubr.msk.f32.vlgmr.msra.gmra.mrb[0].mxu0 %vm50_vm1, %v38_v13 }
  0x7b   :  { %v238_v16 = vadd.f32 %v237_v15, %v236_v14 }
  0x7d   :  { %v239_v32 = vrot.slane %v238_v16, 4 }
  0x7f   :  { %v240_v35 = vadd.f32 %v239_v32, %v238_v16 }
  0x81   :  { %v241_v36 = vrot.slane %v240_v35, 2 }
  0x83   :  { %v242_v38 = vadd.f32 %v241_v36, %v240_v35 }
  0x85   :  { %v243_v42 = vrot.slane %v242_v38, 1 }
  0x87   :  { %v244_v43 = vadd.f32 %v243_v42, %v242_v38 }
  0x89   :  { %v246_v44 = vmul.f32 0.0625, %v244_v43 }
 0x14d   :  { %v295_v21 = vpop.f32.mrb[0].mxu0 }
 0x14e   :  { %v129_v22 = vadd.f32 %v295_v21, %v267_v20  ;;  %v123_v23 = vpop.f32.mrb[1].mxu0 }
 0x14f   :  { %v124_v24 = vadd.f32 %v267_v20, %v123_v23 }
 0x150   :  { %v133_v26 = vmax.f32 %v129_v22, 0.0 }
 0x151   :  { %v132_v25 = vmax.f32 %v124_v24, 0.0 }
 0x153   :  { %300 = vmatprep.mubr.msk.f32.mxu1 %vm36_vm0, %v132_v25 }
 0x154   :  { %301 = vmatmul.mubr.msk.f32.vlgmr.msra.gmra.mrb[0].mxu1 %vm36_vm0, %v133_v26 }
 0x227   :  { %v302_v28 = vpop.f32.mrb[0].mxu1 }
 0x228   :  { %v221_v29 = vadd.f32 %v302_v28, %v270_v27  ;;  %v215_v30 = vpop.f32.mrb[1].mxu1 }
 0x229   :  { %v216_v31 = vadd.f32 %v270_v27, %v215_v30 }
 0x22a   :  { %v274_v33 = vmul.f32 -1.442695, %v221_v29 }
 0x22b   :  { %v273_v34 = vmul.f32 -1.442695, %v216_v31 }
 0x22c   :  { %319 = vpow2.f32 %v274_v33 }
 0x22d   :  { %321 = vpow2.f32 %v273_v34 }
 0x236   :  { %v320_v37 = vpop.eup %319 }
 0x237   :  { %v322_v39 = vpop.eup %321  ;;  %v231_v40 = vadd.f32 1.0, %v320_v37 }
 0x238   :  { %v230_v41 = vadd.f32 1.0, %v322_v39 }
 0x239   :  { %323 = vrcp.f32 %v231_v40 }
 0x23a   :  { %325 = vrcp.f32 %v230_v41 }
 0x243   :  { %v324_v45 = vpop.eup %323 }
 0x244   :  { %v326_v46 = vpop.eup %325  ;;  %v248_v47 = vmul.f32 %v324_v45, %v246_v44 }
 0x245   :  { %v247_v48 = vmul.f32 %v326_v46, %v246_v44 }
 0x246   :  { %250 = vst.msk [vmem:[#allocation2 + $0x8] sm:$0xff] %vm50_vm1, %v248_v47 }
 0x247   :  { %249 = vst.msk [vmem:[#allocation2] sm:$0xff] %vm50_vm1, %v247_v48 }
 0x248   :  { %338 = shalt.err (!%p335_p4)
}
 0x249   :  { %s339_s21 = scalar_lea.hbm %s454_s6, 256 }
 0x24a   :  { %p340_p5 = scmp.ne.s32.totalorder %s454_s6, %s339_s21  ;;  %p343_p6 = scmp.lt.u32.totalorder %s339_s21, %s454_s6 }
 0x24c   :  { %p345_p7 = pnand %p343_p6, %p340_p5 }
 0x24e   :  { %348 = shalt.err (!%p345_p7)
}
 0x24f   :  { %s353_s26 = smov 128   ;;  %s354_s27 = smov 8  }
 0x250   :  { %262 = dma.vmem_to_hbm [thread:$0]  %s257_s4, 256, %s454_s6, [#allocation3], %s353_s26, %s353_s26, %s354_s27  }
 0x251   :  { %349 = dma.done.wait [#allocation3], 256  }
 0x252   :  { %350 = vsyncadd [#allocation3], 4294967040 }
 0x253   :  { %266 = vsyncpa [#allocation3], 1 }

</bundles_post_ra>
